<compile_context>
chip_gen: v7x
topology: tpu7x:2x2x1
jax: 0.10.0
libtpu: 0.0.40
codegen_flags: <defaults>
</compile_context>

<pallas_src>
import math

import jax
import jax.numpy as jnp
from jax import lax
from jax.experimental import pallas as pl
from jax.experimental.pallas import tpu as pltpu


# ----------------------------- Pallas kernel ------------------------------- #

def _bcnet_fused_kernel(v_ref, q_ref, wv_ref, bv_ref, wq_ref, bq_ref,
                        hmat_ref, hbias_ref, o_ref):
    """Fused FCNet(v) + FCNet(q) + low-rank bilinear logits for one batch tile."""
    TB, NVp, v_dim = v_ref.shape
    _, NQ, q_dim = q_ref.shape
    H, Kp = hmat_ref.shape
    cdt = wv_ref.dtype          # MXU compute dtype (bf16 in production, f32 ok)

    # --- FCNet stage: relu(x @ W + b); dropout is identity in eval mode.
    # Leading dims merged so the MXU sees TB*NVp / TB*NQ rows per matmul.
    v2 = v_ref[...].reshape(TB * NVp, v_dim).astype(cdt)
    q2 = q_ref[...].reshape(TB * NQ, q_dim).astype(cdt)
    v_ = jnp.maximum(
        jnp.dot(v2, wv_ref[...], preferred_element_type=jnp.float32) + bv_ref[...],
        0.0)                                                   # (TB*NVp, Kp) f32
    q_ = jnp.maximum(
        jnp.dot(q2, wq_ref[...], preferred_element_type=jnp.float32) + bq_ref[...],
        0.0)                                                   # (TB*NQ, Kp) f32

    # --- Bilinear stage: fold h_mat into v_ -> hv[b, h*NVp+v, k], then one
    # batched MXU pass contracting on K of both operands (lane-dense output).
    v3 = v_.astype(cdt).reshape(TB, NVp, Kp)
    q3 = q_.astype(cdt).reshape(TB, NQ, Kp)
    hv = (hmat_ref[...][None, :, None, :] * v3[:, None, :, :]).reshape(TB, H * NVp, Kp)
    # TODO(synk): confirm via pl.lower_as_mlir that the (H, NVp)->(H*NVp) sublane
    # merge is layout-free (NVp % 8 == 0 by construction); if it materializes a
    # copy, pre-expand h_mat to (H*NVp, Kp) in the wrapper and build hv per head.

    out = lax.dot_general(q3, hv,
                          dimension_numbers=(((2,), (2,)), ((0,), (0,))),
                          preferred_element_type=jnp.float32)   # (TB, NQ, H*NVp)

    o_ref[...] = (out + hbias_ref[...][None, :, :]).astype(o_ref.dtype)


# ------------------------------- glue / model ------------------------------ #

def weight_norm_eff(V, g):
    # torch weight_norm with dim=None: w = g * V / ||V||_F (scalar g).
    return g * V / jnp.sqrt(jnp.sum(V * V))


def init_bcnet_params(key, v_dim, q_dim, h_dim, h_out, k):
    K = h_dim * k
    ks = jax.random.split(key, 6)
    Wv = 0.1 * jax.random.normal(ks[0], (K, v_dim), jnp.float32)   # torch Linear: (out, in)
    bv = 0.1 * jax.random.normal(ks[1], (K,), jnp.float32)
    Wq = 0.1 * jax.random.normal(ks[2], (K, q_dim), jnp.float32)
    bq = 0.1 * jax.random.normal(ks[3], (K,), jnp.float32)
    h_mat = jax.random.normal(ks[4], (h_out, K), jnp.float32)      # torch: (1,h_out,1,K)
    h_bias = jax.random.normal(ks[5], (h_out, 1), jnp.float32)     # torch: (1,h_out,1,1)
    # weight_norm init: g = ||V||_F  (so effective weight == V at init)
    gv = jnp.sqrt(jnp.sum(Wv * Wv))
    gq = jnp.sqrt(jnp.sum(Wq * Wq))
    return dict(Wv=Wv, bv=bv, gv=gv, Wq=Wq, bq=bq, gq=gq,
                h_mat=h_mat, h_bias=h_bias)


def prepare_bcnet_weights(params, NV, compute_dtype=jnp.bfloat16):
    """One-time (eval-mode) weight prep, hoisted out of the per-forward wrapper:
    weight_norm, transpose to (in, out), K padding to a lane multiple, lane-dense
    NV padding sizing, bias layout, and MXU-dtype cast (biases stay f32)."""
    H, K = params["h_mat"].shape
    Wv = weight_norm_eff(params["Wv"], params["gv"]).T             # (v_dim, K)
    Wq = weight_norm_eff(params["Wq"], params["gq"]).T             # (q_dim, K)
    bv = params["bv"][None, :]                                     # (1, K)
    bq = params["bq"][None, :]
    h_mat = params["h_mat"]                                        # (H, K)

    # Pad the contraction dim K to a lane multiple (96 -> 128).  Padded weight /
    # bias / h_mat columns are zero, so the result is bit-identical.
    Kp = -(-K // 128) * 128
    if Kp != K:
        padk = [(0, 0), (0, Kp - K)]
        Wv = jnp.pad(Wv, padk)
        Wq = jnp.pad(Wq, padk)
        bv = jnp.pad(bv, padk)
        bq = jnp.pad(bq, padk)
        h_mat = jnp.pad(h_mat, padk)

    # Lane-dense output columns: NVp such that H*NVp % 128 == 0 (unmasked vst)
    # and NVp % 8 == 0 (tile-aligned sublane merge).  Real BCNet: NV=36 -> NVp=48.
    step = math.lcm(128 // math.gcd(H, 128), 8)
    NVp = -(-NV // step) * step

    # h_bias laid out lane-dense over the flattened (H, NVp) output columns.
    h_bias_flat = jnp.repeat(params["h_bias"].reshape(H), NVp)[None, :]   # (1, H*NVp)

    return dict(Wv=Wv.astype(compute_dtype), Wq=Wq.astype(compute_dtype),
                h_mat=h_mat.astype(compute_dtype),
                bv=bv.astype(jnp.float32), bq=bq.astype(jnp.float32),
                h_bias_flat=h_bias_flat.astype(jnp.float32),
                H=H, NV=NV, NVp=NVp, Kp=Kp)


def bcnet_forward(v, q, prep, *, tb=8, vmem_limit_bytes=None):
    """BCNet.forward, h_out <= c branch.  v: (B,NV,v_dim), q: (B,NQ,q_dim).

    `prep` comes from prepare_bcnet_weights (call once; eval weights are static).
    For production BCNet shapes (K=3072, v_dim=2048) keep compute_dtype=bf16 so
    the resident weights fit v7x's 64 MiB VMEM, and/or raise vmem_limit_bytes
    above v5e's 16 MiB / v6e-v7x's 32 MiB default scoped limit.
    """
    B, NV, v_dim = v.shape
    _, NQ, q_dim = q.shape
    H, NVp, Kp = prep["H"], prep["NVp"], prep["Kp"]
    assert NV == prep["NV"]

    # Pad NV -> NVp (zero rows only feed the padded, sliced-off output columns).
    if NVp != NV:
        v = jnp.pad(v, ((0, 0), (0, NVp - NV), (0, 0)))

    # Batch blocking: TB elements per grid step.  Keep >= 2 B-tiles when B >= 2
    # so the "parallel" grid axis gives v7x's second TensorCore half the batch.
    TB = max(1, min(tb, B))
    if B >= 2:
        TB = min(TB, pl.cdiv(B, 2))
    n_tiles = pl.cdiv(B, TB)
    Bp = n_tiles * TB
    if Bp != B:
        v = jnp.pad(v, ((0, Bp - B), (0, 0), (0, 0)))
        q = jnp.pad(q, ((0, Bp - B), (0, 0), (0, 0)))

    out = pl.pallas_call(
        _bcnet_fused_kernel,
        out_shape=jax.ShapeDtypeStruct((Bp, NQ, H * NVp), jnp.float32),
        grid=(n_tiles,),
        in_specs=[
            pl.BlockSpec((TB, NVp, v_dim), lambda b: (b, 0, 0)),
            pl.BlockSpec((TB, NQ, q_dim), lambda b: (b, 0, 0)),
            # Weights/biases: constant index maps -> VMEM-resident across steps.
            pl.BlockSpec((v_dim, Kp), lambda b: (0, 0)),
            pl.BlockSpec((1, Kp), lambda b: (0, 0)),
            pl.BlockSpec((q_dim, Kp), lambda b: (0, 0)),
            pl.BlockSpec((1, Kp), lambda b: (0, 0)),
            pl.BlockSpec((H, Kp), lambda b: (0, 0)),
            pl.BlockSpec((1, H * NVp), lambda b: (0, 0)),
        ],
        out_specs=pl.BlockSpec((TB, NQ, H * NVp), lambda b: (b, 0, 0)),
        compiler_params=pltpu.CompilerParams(
            dimension_semantics=("parallel",),
            vmem_limit_bytes=vmem_limit_bytes),
    )(v, q, prep["Wv"], prep["bv"], prep["Wq"], prep["bq"],
      prep["h_mat"], prep["h_bias_flat"])

    # Drop batch / NV padding, then wrapper-side layout plumbing back to torch's
    # (B, h_out, NV, NQ).  (If the consumer accepts (B, NQ, H, NV) this
    # transpose can be dropped entirely.)
    out = out[:B].reshape(B, NQ, H, NVp)[..., :NV]
    return out.transpose(0, 2, 3, 1)


def bcnet_forward_ref(v, q, params, compute_dtype=jnp.float32):
    """Plain-JAX reference.  With compute_dtype=f32 this is exactly the torch
    module's math; with bf16 it mirrors the kernel's casting points."""
    cdt = compute_dtype
    Wv = weight_norm_eff(params["Wv"], params["gv"]).astype(cdt)
    Wq = weight_norm_eff(params["Wq"], params["gq"]).astype(cdt)
    v_ = jax.nn.relu(jnp.einsum("bnd,kd->bnk", v.astype(cdt), Wv,
                                preferred_element_type=jnp.float32) + params["bv"])
    q_ = jax.nn.relu(jnp.einsum("bnd,kd->bnk", q.astype(cdt), Wq,
                                preferred_element_type=jnp.float32) + params["bq"])
    hm = params["h_mat"].astype(cdt)
    hv = hm[None, :, None, :] * v_.astype(cdt)[:, None, :, :]      # (B, H, NV, K)
    logits = jnp.einsum("bqk,bhvk->bhvq", q_.astype(cdt), hv,
                        preferred_element_type=jnp.float32)
    return logits + params["h_bias"].reshape(1, -1, 1, 1)


if __name__ == "__main__":
    # Small, BCNet-consistent shapes: v_dim=q_dim=32, h_dim=32, k=3 (K=96),
    # h_out=8 (<= c=32), NV=16, NQ=8 -> kernel output columns H*NVp = 128.
    B, NV, NQ = 2, 16, 8
    v_dim, q_dim, h_dim, h_out, k = 32, 32, 32, 8, 3

    key = jax.random.PRNGKey(0)
    k_params, k_v, k_q = jax.random.split(key, 3)
    params = init_bcnet_params(k_params, v_dim, q_dim, h_dim, h_out, k)
    v = jax.random.normal(k_v, (B, NV, v_dim), jnp.float32)
    q = jax.random.normal(k_q, (B, NQ, q_dim), jnp.float32)

    # f32 path: tight exactness check against the torch-semantics reference.
    prep_f32 = prepare_bcnet_weights(params, NV, compute_dtype=jnp.float32)
    out_f32 = jax.block_until_ready(bcnet_forward(v, q, prep_f32))
    ref_f32 = jax.block_until_ready(bcnet_forward_ref(v, q, params, jnp.float32))
    assert out_f32.shape == (B, h_out, NV, NQ), out_f32.shape
    assert jnp.allclose(out_f32, ref_f32, atol=1e-4, rtol=1e-4), \
        float(jnp.max(jnp.abs(out_f32 - ref_f32)))

    # bf16 MXU path (production config): compare against a bf16-aware reference.
    prep_bf16 = prepare_bcnet_weights(params, NV, compute_dtype=jnp.bfloat16)
    out_bf16 = jax.block_until_ready(bcnet_forward(v, q, prep_bf16))
    ref_bf16 = jax.block_until_ready(bcnet_forward_ref(v, q, params, jnp.bfloat16))
    assert out_bf16.shape == (B, h_out, NV, NQ), out_bf16.shape
    assert jnp.allclose(out_bf16, ref_bf16, atol=2e-2, rtol=2e-2), \
        float(jnp.max(jnp.abs(out_bf16 - ref_bf16)))

    print("KERNEL_OK")
</pallas_src>

<mosaic_0001>
module attributes {stable_mosaic.version = 11 : i64} {
  func.func @_bcnet_fused_kernel(%arg0: i32, %arg1: memref<1x16x32xf32, #tpu.memory_space<vmem>>, %arg2: memref<1x8x32xf32, #tpu.memory_space<vmem>>, %arg3: memref<32x128xf32, #tpu.memory_space<vmem>>, %arg4: memref<1x128xf32, #tpu.memory_space<vmem>>, %arg5: memref<32x128xf32, #tpu.memory_space<vmem>>, %arg6: memref<1x128xf32, #tpu.memory_space<vmem>>, %arg7: memref<8x128xf32, #tpu.memory_space<vmem>>, %arg8: memref<1x128xf32, #tpu.memory_space<vmem>>, %arg9: memref<1x8x128xf32, #tpu.memory_space<vmem>>) attributes {dimension_semantics = [#tpu.dimension_semantics<parallel>], iteration_bounds = array<i64: 2>, scalar_prefetch = 0 : i64, scratch_operands = 0 : i64, tpu.core_type = #tpu.core_type<tc>, window_params = [{transform_indices = @transform_0, window_bounds = array<i64: 1, 16, 32>}, {transform_indices = @transform_1, window_bounds = array<i64: 1, 8, 32>}, {pipeline_mode = #tpu.pipeline_mode<synchronous>, transform_indices = @transform_2, window_bounds = array<i64: 32, 128>}, {pipeline_mode = #tpu.pipeline_mode<synchronous>, transform_indices = @transform_3, window_bounds = array<i64: 1, 128>}, {pipeline_mode = #tpu.pipeline_mode<synchronous>, transform_indices = @transform_4, window_bounds = array<i64: 32, 128>}, {pipeline_mode = #tpu.pipeline_mode<synchronous>, transform_indices = @transform_5, window_bounds = array<i64: 1, 128>}, {pipeline_mode = #tpu.pipeline_mode<synchronous>, transform_indices = @transform_6, window_bounds = array<i64: 8, 128>}, {pipeline_mode = #tpu.pipeline_mode<synchronous>, transform_indices = @transform_7, window_bounds = array<i64: 1, 128>}, {transform_indices = @transform_8, window_bounds = array<i64: 1, 8, 128>}]} {
    %c0 = arith.constant 0 : index
    %c0_0 = arith.constant 0 : index
    %c0_1 = arith.constant 0 : index
    %0 = vector.load %arg1[%c0, %c0_0, %c0_1] : memref<1x16x32xf32, #tpu.memory_space<vmem>>, vector<1x16x32xf32>
    %1 = vector.shape_cast %0 : vector<1x16x32xf32> to vector<16x32xf32>
    %c0_2 = arith.constant 0 : index
    %c0_3 = arith.constant 0 : index
    %c0_4 = arith.constant 0 : index
    %2 = vector.load %arg2[%c0_2, %c0_3, %c0_4] : memref<1x8x32xf32, #tpu.memory_space<vmem>>, vector<1x8x32xf32>
    %3 = vector.shape_cast %2 : vector<1x8x32xf32> to vector<8x32xf32>
    %c0_5 = arith.constant 0 : index
    %c0_6 = arith.constant 0 : index
    %4 = vector.load %arg3[%c0_5, %c0_6] : memref<32x128xf32, #tpu.memory_space<vmem>>, vector<32x128xf32>
    %cst = arith.constant dense<0.000000e+00> : vector<16x128xf32>
    %5 = tpu.matmul %1, %4, %cst {dimension_numbers = #tpu.dot_dimension_numbers<[1], [0], [0], [1], [0, 0, 1, 1], [], []>} : vector<16x32xf32>, vector<32x128xf32>, vector<16x128xf32> -> vector<16x128xf32>
    %c0_7 = arith.constant 0 : index
    %c0_8 = arith.constant 0 : index
    %6 = vector.load %arg4[%c0_7, %c0_8] : memref<1x128xf32, #tpu.memory_space<vmem>>, vector<1x128xf32>
    %7 = vector.broadcast %6 : vector<1x128xf32> to vector<16x128xf32>
    %8 = arith.addf %5, %7 : vector<16x128xf32>
    %cst_9 = arith.constant 0.000000e+00 : f32
    %9 = vector.broadcast %cst_9 : f32 to vector<16x128xf32>
    %10 = arith.maximumf %8, %9 : vector<16x128xf32>
    %c0_10 = arith.constant 0 : index
    %c0_11 = arith.constant 0 : index
    %11 = vector.load %arg5[%c0_10, %c0_11] : memref<32x128xf32, #tpu.memory_space<vmem>>, vector<32x128xf32>
    %cst_12 = arith.constant dense<0.000000e+00> : vector<8x128xf32>
    %12 = tpu.matmul %3, %11, %cst_12 {dimension_numbers = #tpu.dot_dimension_numbers<[1], [0], [0], [1], [0, 0, 1, 1], [], []>} : vector<8x32xf32>, vector<32x128xf32>, vector<8x128xf32> -> vector<8x128xf32>
    %c0_13 = arith.constant 0 : index
    %c0_14 = arith.constant 0 : index
    %13 = vector.load %arg6[%c0_13, %c0_14] : memref<1x128xf32, #tpu.memory_space<vmem>>, vector<1x128xf32>
    %14 = vector.broadcast %13 : vector<1x128xf32> to vector<8x128xf32>
    %15 = arith.addf %12, %14 : vector<8x128xf32>
    %cst_15 = arith.constant 0.000000e+00 : f32
    %16 = vector.broadcast %cst_15 : f32 to vector<8x128xf32>
    %17 = arith.maximumf %15, %16 : vector<8x128xf32>
    %18 = vector.shape_cast %10 : vector<16x128xf32> to vector<1x16x128xf32>
    %19 = vector.shape_cast %17 : vector<8x128xf32> to vector<1x8x128xf32>
    %c0_16 = arith.constant 0 : index
    %c0_17 = arith.constant 0 : index
    %20 = vector.load %arg7[%c0_16, %c0_17] : memref<8x128xf32, #tpu.memory_space<vmem>>, vector<8x128xf32>
    %21 = vector.shape_cast %20 : vector<8x128xf32> to vector<1x8x1x128xf32>
    %22 = vector.shape_cast %18 : vector<1x16x128xf32> to vector<1x1x16x128xf32>
    %23 = vector.broadcast %21 : vector<1x8x1x128xf32> to vector<1x8x16x128xf32>
    %24 = vector.broadcast %22 : vector<1x1x16x128xf32> to vector<1x8x16x128xf32>
    %25 = arith.mulf %23, %24 : vector<1x8x16x128xf32>
    %26 = vector.shape_cast %25 : vector<1x8x16x128xf32> to vector<1x128x128xf32>
    %cst_18 = arith.constant dense<0.000000e+00> : vector<1x8x128xf32>
    %27 = tpu.matmul %19, %26, %cst_18 {dimension_numbers = #tpu.dot_dimension_numbers<[2], [2], [1], [1], [0, 0, 0, 1, 1, 1], [0], [0]>} : vector<1x8x128xf32>, vector<1x128x128xf32>, vector<1x8x128xf32> -> vector<1x8x128xf32>
    %c0_19 = arith.constant 0 : index
    %c0_20 = arith.constant 0 : index
    %28 = vector.load %arg8[%c0_19, %c0_20] : memref<1x128xf32, #tpu.memory_space<vmem>>, vector<1x128xf32>
    %29 = vector.shape_cast %28 : vector<1x128xf32> to vector<1x1x128xf32>
    %30 = vector.broadcast %29 : vector<1x1x128xf32> to vector<1x8x128xf32>
    %31 = arith.addf %27, %30 : vector<1x8x128xf32>
    %c0_21 = arith.constant 0 : index
    %c0_22 = arith.constant 0 : index
    %c0_23 = arith.constant 0 : index
    %32 = vector.load %arg9[%c0_21, %c0_22, %c0_23] : memref<1x8x128xf32, #tpu.memory_space<vmem>>, vector<1x8x128xf32>
    tpu.vector_store %arg9[%c0_21, %c0_22, %c0_23], %31 {strides = array<i32>} : memref<1x8x128xf32, #tpu.memory_space<vmem>>, vector<1x8x128xf32>,
    return
  }
  func.func @transform_0(%arg0: i32) -> (i32, i32, i32) {
    %c0_i32 = arith.constant 0 : i32
    %c0_i32_0 = arith.constant 0 : i32
    %c0_i32_1 = arith.constant 0 : i32
    return %arg0, %c0_i32, %c0_i32_0 : i32, i32, i32
  }
  func.func @transform_1(%arg0: i32) -> (i32, i32, i32) {
    %c0_i32 = arith.constant 0 : i32
    %c0_i32_0 = arith.constant 0 : i32
    %c0_i32_1 = arith.constant 0 : i32
    return %arg0, %c0_i32, %c0_i32_0 : i32, i32, i32
  }
  func.func @transform_2(%arg0: i32) -> (i32, i32) {
    %c0_i32 = arith.constant 0 : i32
    %c0_i32_0 = arith.constant 0 : i32
    %c0_i32_1 = arith.constant 0 : i32
    return %c0_i32, %c0_i32_0 : i32, i32
  }
  func.func @transform_3(%arg0: i32) -> (i32, i32) {
    %c0_i32 = arith.constant 0 : i32
    %c0_i32_0 = arith.constant 0 : i32
    %c0_i32_1 = arith.constant 0 : i32
    return %c0_i32, %c0_i32_0 : i32, i32
  }
  func.func @transform_4(%arg0: i32) -> (i32, i32) {
    %c0_i32 = arith.constant 0 : i32
    %c0_i32_0 = arith.constant 0 : i32
    %c0_i32_1 = arith.constant 0 : i32
    return %c0_i32, %c0_i32_0 : i32, i32
  }
  func.func @transform_5(%arg0: i32) -> (i32, i32) {
    %c0_i32 = arith.constant 0 : i32
    %c0_i32_0 = arith.constant 0 : i32
    %c0_i32_1 = arith.constant 0 : i32
    return %c0_i32, %c0_i32_0 : i32, i32
  }
  func.func @transform_6(%arg0: i32) -> (i32, i32) {
    %c0_i32 = arith.constant 0 : i32
    %c0_i32_0 = arith.constant 0 : i32
    %c0_i32_1 = arith.constant 0 : i32
    return %c0_i32, %c0_i32_0 : i32, i32
  }
  func.func @transform_7(%arg0: i32) -> (i32, i32) {
    %c0_i32 = arith.constant 0 : i32
    %c0_i32_0 = arith.constant 0 : i32
    %c0_i32_1 = arith.constant 0 : i32
    return %c0_i32, %c0_i32_0 : i32, i32
  }
  func.func @transform_8(%arg0: i32) -> (i32, i32, i32) {
    %c0_i32 = arith.constant 0 : i32
    %c0_i32_0 = arith.constant 0 : i32
    %c0_i32_1 = arith.constant 0 : i32
    return %arg0, %c0_i32, %c0_i32_0 : i32, i32, i32
  }
}

</mosaic_0001>

<bundles_post_ra>
// kernel: tpu_custom_call.1
= control target key start
LH: loop header
LB: loop body
LE: loop exit
PB: predicated region body
PF: predicated region fallthrough
CT: control target
= control target key end

     0   :  { %s1688_s0 = inlined_call_operand.hbm [shape: f32[2,16,32], index: 0, kind: input, shape index: {}]   ;;  %s1689_s1 = inlined_call_operand.hbm [shape: f32[2,8,32], index: 1, kind: input, shape index: {}]   ;;  %s1690_s2 = inlined_call_operand.hbm [shape: f32[32,128], index: 2, kind: input, shape index: {}]   ;;  %s1691_s3 = inlined_call_operand.vmem [shape: f32[1,128], index: 3, kind: input, shape index: {}]   ;;  %s1692_s4 = inlined_call_operand.hbm [shape: f32[32,128], index: 4, kind: input, shape index: {}]   ;;  %s1693_s5 = inlined_call_operand.vmem [shape: f32[1,128], index: 5, kind: input, shape index: {}]   ;;  %s1694_s6 = inlined_call_operand.vmem [shape: f32[8,128], index: 6, kind: input, shape index: {}]   ;;  %s1695_s7 = inlined_call_operand.vmem [shape: f32[1,128], index: 7, kind: input, shape index: {}]   ;;  %s1696_s8 = inlined_call_operand.hbm [shape: f32[2,8,128], index: 8, kind: output, shape index: {}]  }
   0x1   :  { %1706 = sst [smem:[#allocation19_spill]] %s1688_s0 }
   0x2   :  { %1707 = sst [smem:[#allocation20_spill]] %s1690_s2 }
   0x3   :  { %1708 = sst [smem:[#allocation21_spill]] %s1692_s4 }
   0x4   :  { %13 = vsyncpa [#allocation3], 0 }
   0x5   :  { %15 = vsyncpa [#allocation3 + $0x1], 0 }
   0x6   :  { %16 = vsyncpa [#allocation6], 0 }
   0x7   :  { %18 = vsyncpa [#allocation6 + $0x1], 0 }
   0x8   :  { %19 = vsyncpa [#allocation9], 0 }
   0x9   :  { %20 = vsyncpa [#allocation4], 0 }
   0xa   :  { %22 = vsyncpa [#allocation4 + $0x1], 0  ;;  %s1365_s27 = smov 0   ;;  %s1367_s28 = smov 0  }
   0xb   :  { %s1369_s29 = smov 0   ;;  %s1371_s30 = smov 0  }
   0xc LB: > { %1709 = sst [smem:[#allocation16_spill]] %s1303_s29  ;;  %s1386_s9 = sadd.s32 4294967295, %s1307_s30   ;;  %s1307_s30 = sphi %s1371_s30, %s1734_s30   ;;  %s1303_s29 = sphi %s1369_s29, %s1736_s29   ;;  %s1299_s28 = sphi %s1367_s28, %s1738_s28   ;;  %s1295_s27 = sphi %s1365_s27, %s1737_s27  }
   0xd   : > { %s884_s10 = sadd.s32 4294967294, %s1307_s30   ;;  %p48_p0 = scmp.ne.s32.totalorder %s1299_s28, %s1295_s27 }
   0xe   : > { %p1697_p1 = scmp.eq.s32.totalorder %s1386_s9, 0  ;;  %p230_p3 = scmp.eq.s32.totalorder %s884_s10, 1 }
   0xf   : > { %p885_p5 = scmp.ge.s32.totalorder %s1307_s30, 1  ;;  %p237_p7 = scmp.lt.s32.totalorder %s1307_s30, 3 }
  0x10   : > { %p1395_p4 = por %p1697_p1, %p48_p0  ;;  %p1400_p6 = por %p230_p3, %p48_p0 }
  0x11   : > { %p1405_p8 = pnand %p885_p5, %p237_p7  ;;  %s1309_s14 = smov [#allocation7]  }
  0x12   : > { %s1710_s11 = scalar_select %p1395_p4, 1, 0 }
  0x13   : > { %s1711_s12 = scalar_select %p1400_p6, 1, 0 }
  0x14   : > { %s1712_s13 = scalar_select %p1405_p8, 1, 0 }
  0x15   : > { %s249_s15 = sshll.u32 %s1309_s14, 4  ;;  %p1048_p9 = pneg %p1405_p8  ;;  %s1409_s15 = int_to_ptr.vmem [resolvable:$true] %s249_s15 }
  0x16   : > { %s1310_s17 = smov [#allocation8]   ;;  %s1714_s2 = sld [smem:[#allocation20_spill]] }
  0x17   : > { %p1416_p11 = pnand %p1048_p9, %p1697_p1  ;;  %s265_s18 = sshll.u32 %s1310_s17, 4  ;;  %s1420_s18 = int_to_ptr.vmem [resolvable:$true] %s265_s18 }
  0x19   : > { %p1115_p13 = pneg %p1416_p11 }
  0x1c   : > { %s1113_s21 = scalar_lea.hbm %s1714_s2, 512 }
  0x1d   : > { %p1114_p12 = scmp.ne.s32.totalorder %s1714_s2, %s1113_s21  ;;  %p1120_p5 = scmp.lt.u32.totalorder %s1113_s21, %s1714_s2 }
  0x1f   : > { %p1116_p0 = pnand %p1115_p13, %p1114_p12 }
  0x21   : > { %p1117_p3 = pneg %p1116_p0 }
  0x23   : > { %p1122_p7 = pnand %p1120_p5, %p1117_p3 }
  0x25   : > { %1125 = shalt.err (!%p1122_p7)
}
  0x26   : > { %s1126_s26 = scalar_lea.vmem %s1409_s15, 512  ;;  %p1134_p2 = scmp.lt.s32.totalorder %s1409_s15, %s1409_s15 }
  0x27   : > { %p1127_p9 = scmp.ne.s32.totalorder %s1409_s15, %s1126_s26  ;;  %p1135_p12 = scmp.lt.s32.totalorder %s1126_s26, %s1126_s26 }
  0x29   : > { %p1129_p10 = pnand %p1127_p9, %p1115_p13  ;;  %p1136_p0 = por %p1135_p12, %p1134_p2 }
  0x2b   : > { %p1130_p1 = pneg %p1129_p10 }
  0x2d   : > { %p1137_p6 = pnand %p1136_p0, %p1130_p1 }
  0x2f   : > { %1140 = shalt.err (!%p1137_p6)
}
  0x30   : > { %s1698_s10 = smov 128   ;;  %s1699_s14 = smov 8  }
  0x31   : > { %1051 = dma.hbm_to_vmem [thread:$0]  (!%p1416_p11), %s1714_s2, 512, %s1409_s15, [#allocation6], %s1698_s10, %s1698_s10, %s1699_s14  }
  0x32   : > { %s1715_s4 = sld [smem:[#allocation21_spill]] }
  0x38   : > { %s1141_s22 = scalar_lea.hbm %s1715_s4, 512 }
  0x39   : > { %p1142_p1 = scmp.ne.s32.totalorder %s1715_s4, %s1141_s22  ;;  %p1148_p10 = scmp.lt.u32.totalorder %s1141_s22, %s1715_s4 }
  0x3b   : > { %p1144_p2 = pnand %p1142_p1, %p1115_p13 }
  0x3d   : > { %p1145_p6 = pneg %p1144_p2 }
  0x3f   : > { %p1150_p3 = pnand %p1148_p10, %p1145_p6 }
  0x41   : > { %1153 = shalt.err (!%p1150_p3)
}
  0x42   : > { %s1154_s15 = scalar_lea.vmem %s1420_s18, 512  ;;  %p1162_p12 = scmp.lt.s32.totalorder %s1420_s18, %s1420_s18 }
  0x43   : > { %p1155_p5 = scmp.ne.s32.totalorder %s1420_s18, %s1154_s15  ;;  %p1163_p0 = scmp.lt.s32.totalorder %s1154_s15, %s1154_s15 }
  0x45   : > { %p1157_p7 = pnand %p1155_p5, %p1115_p13  ;;  %p1164_p1 = por %p1163_p0, %p1162_p12 }
  0x47   : > { %p1158_p9 = pneg %p1157_p7 }
  0x49   : > { %p1165_p2 = pnand %p1164_p1, %p1158_p9 }
  0x4b   : > { %1168 = shalt.err (!%p1165_p2)
}
  0x4c   : > { %1054 = dma.hbm_to_vmem [thread:$0]  (!%p1416_p11), %s1715_s4, 512, %s1420_s18, [#allocation9], %s1698_s10, %s1698_s10, %s1699_s14  }
  0x4d   : > { %s1481_s16 = sadd.s32 1, %s1307_s30   ;;  %s35_s20 = sadd.s32 1, %s1303_s29 }
  0x4e   : > { %1716 = sst [smem:[#allocation17_spill]] %s1481_s16  ;;  %s32_s21 = ssub.s32 %s1307_s30, %s1481_s16 }
  0x4f   : > { %p42_p13 = scmp.ne.s32.totalorder %s1303_s29, %s1299_s28  ;;  %p33_p6 = scmp.eq.s32.totalorder %s32_s21, 0 }
  0x50   : > { %p43_p10 = scmp.eq.s32.totalorder %s1307_s30, 0  ;;  %p1717_p3 = scmp.eq.s32.totalorder %s1386_s9, 1 }
  0x51   : > { %p1068_p7 = scmp.lt.s32.totalorder %s1307_s30, 2  ;;  %s1500_s24 = sand.u32 1, %s1303_s29  }
  0x52   : > { %p1491_p5 = por %p1717_p3, %p42_p13  ;;  %p44_p9 = por %p43_p10, %p42_p13 }
  0x53   : > { %s1497_s23 = scalar_select %p33_p6, %s1303_s29, %s35_s20  }
  0x54   : > { %s1718_s22 = scalar_select %p1491_p5, 1, 0 }
  0x55   : > { %1719 = sst [smem:[#allocation18_spill]] %s1497_s23  ;;  %s889_s18 = sshll.u32 %s1500_s24, 4 }
  0x56   : > { %s910_s25 = sshll.u32 %s1307_s30, 8  ;;  %s1720_s0 = sld [smem:[#allocation19_spill]] }
  0x57   : > { %s292_s19 = scalar_lea.vmem [#allocation2], %s889_s18  ;;  %p1511_p11 = pnand %p1068_p7, %p44_p9 }
  0x58   : > { %s299_s20 = sshll.u32 %s292_s19, 4  ;;  %s892_s14 = sshll.u32 %s1500_s24, 3  ;;  %s1509_s20 = int_to_ptr.vmem [resolvable:$true] %s299_s20 }
  0x59   : > { %s289_s2 = scalar_lea.sflag [#allocation3], %s1500_s24  ;;  %p1171_p0 = pneg %p1511_p11 }
  0x5c   : > { %s1507_s17 = scalar_lea.hbm %s1720_s0, %s910_s25  ;;  %s1174_s15 = scalar_lea.hbm %s1720_s0, 512 }
  0x5d   : > { %s1169_s26 = scalar_lea.hbm %s1507_s17, 256  ;;  %p1175_p13 = scmp.lt.u32.totalorder %s1507_s17, %s1720_s0 }
  0x5e   : > { %p1170_p12 = scmp.ne.s32.totalorder %s1507_s17, %s1169_s26  ;;  %p1176_p6 = scmp.lt.u32.totalorder %s1174_s15, %s1169_s26 }
  0x5f   : > { %p1178_p3 = scmp.lt.u32.totalorder %s1169_s26, %s1507_s17 }
  0x60   : > { %p1172_p1 = pnand %p1171_p0, %p1170_p12  ;;  %p1177_p10 = por %p1176_p6, %p1175_p13 }
  0x62   : > { %p1173_p2 = pneg %p1172_p1  ;;  %p1179_p7 = por %p1178_p3, %p1177_p10 }
  0x64   : > { %p1180_p9 = pnand %p1179_p7, %p1173_p2 }
  0x66   : > { %1183 = shalt.err (!%p1180_p9)
}
  0x67   : > { %s1184_s10 = scalar_lea.vmem %s1509_s20, 256  ;;  %s1313_s18 = smov [#allocation2]  }
  0x68   : > { %p1185_p12 = scmp.ne.s32.totalorder %s1509_s20, %s1184_s10  ;;  %s1189_s25 = sshll.u32 %s1313_s18, 4  ;;  %s1190_s25 = int_to_ptr.vmem [resolvable:$false] %s1189_s25 }
  0x69   : > { %s1191_s4 = scalar_lea.vmem %s1190_s25, 512  ;;  %p1192_p4 = scmp.lt.s32.totalorder %s1509_s20, %s1190_s25 }
  0x6a   : > { %p1187_p1 = pnand %p1185_p12, %p1171_p0  ;;  %p1193_p13 = scmp.lt.s32.totalorder %s1191_s4, %s1184_s10 }
  0x6c   : > { %p1188_p5 = pneg %p1187_p1  ;;  %p1194_p6 = por %p1193_p13, %p1192_p4 }
  0x6e   : > { %p1195_p10 = pnand %p1194_p6, %p1188_p5 }
  0x70   : > { %1198 = shalt.err (!%p1195_p10)
}
  0x71   : > { %s1722_s26 = smov 8   ;;  %s1723_s15 = smov 128  }
  0x72   : > { %1058 = dma.hbm_to_vmem [thread:$0]  (!%p1511_p11), %s1507_s17, 256, %s1509_s20, %s289_s2, %s1723_s15, %s1723_s15, %s1722_s26  }
  0x73   : > { %s893_s19 = sshll.u32 %s1307_s30, 7  ;;  %s313_s4 = scalar_lea.vmem [#allocation5], %s892_s14 }
  0x74   : > { %s1552_s25 = scalar_lea.hbm %s1689_s1, %s893_s19  ;;  %s320_s0 = sshll.u32 %s313_s4, 4  ;;  %s321_s0 = int_to_ptr.vmem [resolvable:$true] %s320_s0 }
  0x75   : > { %s1724_s23 = sand.u32 1, %s1307_s30   ;;  %s1199_s16 = scalar_lea.hbm %s1552_s25, 128 }
  0x76   : > { %s310_s29 = scalar_lea.sflag [#allocation6], %s1724_s23  ;;  %p1200_p4 = scmp.ne.s32.totalorder %s1552_s25, %s1199_s16 }
  0x77   : > { %s1204_s20 = scalar_lea.hbm %s1689_s1, 256  ;;  %p1205_p3 = scmp.lt.u32.totalorder %s1552_s25, %s1689_s1 }
  0x78   : > { %p1202_p5 = pnand %p1200_p4, %p1171_p0  ;;  %p1206_p7 = scmp.lt.u32.totalorder %s1204_s20, %s1199_s16 }
  0x79   : > { %p1208_p12 = scmp.lt.u32.totalorder %s1199_s16, %s1552_s25 }
  0x7a   : > { %p1203_p2 = pneg %p1202_p5  ;;  %p1207_p9 = por %p1206_p7, %p1205_p3 }
  0x7c   : > { %p1209_p1 = por %p1208_p12, %p1207_p9 }
  0x7e   : > { %p1210_p13 = pnand %p1209_p1, %p1203_p2 }
  0x80   : > { %1213 = shalt.err (!%p1210_p13)
}
  0x81   : > { %s1214_s14 = scalar_lea.vmem %s321_s0, 128  ;;  %s1314_s23 = smov [#allocation5]  }
  0x82   : > { %p1215_p6 = scmp.ne.s32.totalorder %s321_s0, %s1214_s14  ;;  %s1219_s15 = sshll.u32 %s1314_s23, 4  ;;  %s1220_s15 = int_to_ptr.vmem [resolvable:$false] %s1219_s15 }
  0x83   : > { %s1221_s19 = scalar_lea.vmem %s1220_s15, 256  ;;  %p1222_p5 = scmp.lt.s32.totalorder %s321_s0, %s1220_s15 }
  0x84   : > { %p1217_p10 = pnand %p1215_p6, %p1171_p0  ;;  %p1223_p8 = scmp.lt.s32.totalorder %s1221_s19, %s1214_s14 }
  0x86   : > { %p1218_p4 = pneg %p1217_p10  ;;  %p1224_p3 = por %p1223_p8, %p1222_p5 }
  0x88   : > { %p1225_p7 = pnand %p1224_p3, %p1218_p4 }
  0x8a   : > { %1228 = shalt.err (!%p1225_p7)
}
  0x8b   : > { %1061 = dma.hbm_to_vmem [thread:$0]  (!%p1511_p11), %s1552_s25, 128, %s321_s0, %s310_s29  }
  0x8c   : > { %p1725_p2 = scmp.ne.s32.totalorder %s1712_s13, 0 }
  0x8d   : > { %s1580_s16 = sand.u32 (!%p1725_p2), 1, %s1299_s28   ;;  %p1726_p8 = scmp.ne.s32.totalorder (!%p1725_p2), %s1710_s11, 0 }
  0x8e   : > { %329 = sbr.rel (%p1725_p2) target bundleno = 684 (0x2ac), region = 52  ;;  %s895_s18 = sshll.u32 (!%p1725_p2), %s1580_s16, 4 }
  0x8f   : > { %s332_s10 = scalar_lea.sflag (!%p1725_p2), [#allocation3], %s1580_s16  ;;  %s1584_s4 = scalar_lea.vmem (!%p1725_p2), [#allocation2], %s895_s18 }
  0x95   : > { %1274 = dma.done.wait (%p1726_p8), %s332_s10, 256  }
  0x96   : > { %1276 = vsyncadd (%p1726_p8), %s332_s10, 4294967040  ;;  %s340_s0 = sand.u32 1, %s1386_s9   ;;  %s896_s29 = sshll.u32 %s1580_s16, 3 }
  0x97   : > { %s341_s13 = scalar_lea.sflag [#allocation6], %s340_s0  ;;  %s1594_s21 = scalar_lea.vmem [#allocation5], %s896_s29 }
  0x98   : > { %1278 = dma.done.wait (%p1726_p8), %s341_s13, 128  }
  0x99   : > { %1280 = vsyncadd (%p1726_p8), %s341_s13, 4294967168  ;;  %p1727_p11 = scmp.eq.s32.totalorder %s1386_s9, 0 }
  0x9b   : > { %1282 = dma.done.wait (%p1727_p11), [#allocation6], 512   ;;  %p1728_p0 = pmov %p1727_p11 }
  0x9d   : > { %1284 = vsyncadd (%p1728_p0), [#allocation6], 4294966784  ;;  %p1729_p9 = pmov %p1728_p0 }
  0x9e   : > { %p1730_p12 = pmov %p1728_p0 }
  0x9f   : > { %1286 = dma.done.wait (%p1729_p9), [#allocation9], 512  }
  0xa0   : > { %1288 = vsyncadd (%p1730_p12), [#allocation9], 4294966784  ;;  %v1315_v0 = vmov 0.0|0.0   ;;  %vm1316_vm0 = vmmov 0   ;;  %v1317_v1 = vmov 0.0   ;;  %vm404_vm1 = vcmask 261120  }
  0xa1   : > { %1010 = vmatprep.subr.bf16.mxu0 %v1315_v0  ;;  %993 = vmatprep.mubr.msk.f32.mxu0 %vm1316_vm0, %v1317_v1  ;;  %v393_v2 = vld [vmem:[#allocation7] sm:$0xff]  ;;  %v394_v3 = vld [vmem:[#allocation7 + $0x8] sm:$0xff]  ;;  %v395_v4 = vld [vmem:[#allocation7 + $0x10] sm:$0xff]  ;;  %v1318_v17 = vmov 1966171168   ;;  %v579_v19 = vlaneseq  ;;  %s907_s23 = sshll.u32 %s1386_s9, 7 }
  0xa2   : > { %v996_v5 = vpack.c.bf16 %v394_v3, %v393_v2  ;;  %v396_v6 = vld [vmem:[#allocation7 + $0x18] sm:$0xff]  ;;  %v390_v7 = vld [vmem:[%s1584_s4] sm:$0xff]  ;;  %v489_v10 = vld [vmem:[#allocation8 + $0x8] sm:$0xff]  ;;  %v577_v18 = vunpack.c.l.s4 %v1318_v17  ;;  %s389_s15 = scalar_lea.vmem [#allocation10], %s896_s29  ;;  %s759_s0 = scalar_lea.sflag [#allocation4], %s1580_s16 }
  0xa3   : > { %v1000_v8 = vpack.c.bf16 %v396_v6, %v395_v4  ;;  %947 = vmatprep.mubr.msk.f32.mxu1 %vm404_vm1, %v390_v7  ;;  %v488_v9 = vld [vmem:[#allocation8] sm:$0xff]  ;;  %v391_v11 = vld [vmem:[%s1584_s4 + $0x8] sm:$0xff]  ;;  %v490_v13 = vld [vmem:[#allocation8 + $0x10] sm:$0xff]  ;;  %v580_v21 = vshrl.u32 %v579_v19, 7  ;;  %s772_s19 = sshll.u32 %s389_s15, 4  ;;  %s1644_s4 = scalar_lea.hbm %s1696_s8, %s907_s23  ;;  %s1646_s19 = int_to_ptr.vmem [resolvable:$true] %s772_s19 }
  0xa4   : > { %997 = vmatprep.subr.bf16.mxu1 %v996_v5  ;;  %v1005_v12 = vpack.c.bf16 %v489_v10, %v488_v9  ;;  %v491_v14 = vld [vmem:[#allocation8 + $0x18] sm:$0xff]  ;;  %v578_v20 = vunpack.c.0.s8 %v577_v18  ;;  %v573_v22 = vld [vmem:[%s1694_s6] sm:$0xff]  ;;  %s1229_s13 = scalar_lea.vmem %s1646_s19, 128  ;;  %p1731_p13 = scmp.ne.s32.totalorder %s1718_s22, 0 }
  0xa5   : > { %999 = vmatpush3.bf16.msra.mxu1 %v996_v5  ;;  %v1008_v15 = vpack.c.bf16 %v491_v14, %v490_v13  ;;  %v392_v16 = vld [vmem:[%s1594_s21] sm:$0xff]  ;;  %v575_v24 = vcombine.high %v573_v22, %v573_v22  ;;  %v626_v31 = vsub.s32 0, %v580_v21  ;;  %p1230_p1 = scmp.ne.s32.totalorder %s1646_s19, %s1229_s13  ;;  %s1319_s9 = smov [#allocation10]  }
  0xa6   : > { %1001 = vmatprep.subr.bf16.mxu1 %v1000_v8  ;;  %v581_v23 = vsub.s32 %v578_v20, %v580_v21  ;;  %v900_v36 = vld [vmem:[%s1691_s3] ss:$0 sm:$0xff]  ;;  %s1233_s29 = sshll.u32 %s1319_s9, 4  ;;  %s1234_s29 = int_to_ptr.vmem [resolvable:$false] %s1233_s29 }
  0xa7   : > { %v905_v19 = vld [vmem:[%s1695_s7] ss:$0 sm:$0xff]  ;;  %p1231_p6 = pnand %p1230_p1, %p1731_p13  ;;  %s1235_s21 = scalar_lea.vmem %s1234_s29, 256 }
  0xa8   : > { %v582_v25 = vrot.slane %v573_v22, %v581_v23  ;;  %v589_v26 = vrot.slane %v575_v24, %v581_v23  ;;  %p1236_p4 = scmp.lt.s32.totalorder %s1646_s19, %s1234_s29  ;;  %p1237_p5 = scmp.lt.s32.totalorder %s1235_s21, %s1229_s13 }
  0xa9   : > { %1003 = vmatpush3.bf16.msra.mxu1 %v1000_v8  ;;  %p1232_p10 = pneg %p1231_p6 }
  0xaa   : > { %1004 = vmatprep.subr.bf16.mxu1 %v1315_v0  ;;  %v590_v27 = vcombine.high %v582_v25, %v582_v25  ;;  %v591_v28 = vcombine.high %v589_v26, %v589_v26  ;;  %v598_v29 = vrot.slane %v582_v25, %v581_v23  ;;  %v605_v32 = vrot.slane %v589_v26, %v581_v23  ;;  %p1238_p3 = por %p1237_p5, %p1236_p4 }
  0xac   : > { %948 = vmatmul.mubr.msk.f32.vlgmr.msra.gmra.mrb[0].mxu1 %vm404_vm1, %v391_v11  ;;  %v612_v30 = vrot.slane %v590_v27, %v581_v23  ;;  %v619_v33 = vrot.slane %v591_v28, %v581_v23  ;;  %v620_v34 = vcombine.high %v598_v29, %v598_v29  ;;  %v627_v38 = vrot.slane %v598_v29, %v626_v31  ;;  %p1239_p7 = pnand %p1238_p3, %p1232_p10 }
  0xad   : > { %1006 = vmatpush3.bf16.msra.mxu1 %v1005_v12  ;;  %958 = vmatprep.mubr.msk.f32.mxu1 %vm1316_vm0, %v1317_v1  ;;  %v621_v39 = vcombine.high %v605_v32, %v605_v32  ;;  %v643_v48 = vrot.slane %v605_v32, %v626_v31 }
  0xae   : > { %1007 = vmatprep.subr.bf16.mxu1 %v1315_v0  ;;  %v622_v35 = vcombine.high %v612_v30, %v612_v30  ;;  %v623_v40 = vcombine.high %v619_v33, %v619_v33  ;;  %v631_v43 = vrot.slane %v612_v30, %v626_v31  ;;  %v635_v44 = vrot.slane %v620_v34, %v626_v31 }
  0xaf   : > { %v647_v49 = vrot.slane %v619_v33, %v626_v31  ;;  %v651_v51 = vrot.slane %v621_v39, %v626_v31 }
  0xb0   : > { %v639_v45 = vrot.slane %v622_v35, %v626_v31  ;;  %v655_v52 = vrot.slane %v623_v40, %v626_v31 }
  0xb1   : > { %1009 = vmatpush3.bf16.msra.mxu1 %v1008_v15 }
  0xb4   : > { %959 = vmatmul.mubr.msk.f32.vlgmr.msra.gmra.mrb[2].mxu1 %vm404_vm1, %v392_v16  ;;  %v903_v16 = vld [vmem:[%s1693_s5] ss:$0 sm:$0xff] }
 0x17f   : > { %v949_v37 = vpop.f32.mrb[0].mxu1 }
 0x180   : > { %v483_v41 = vadd.f32 %v949_v37, %v900_v36  ;;  %v477_v42 = vpop.f32.mrb[1].mxu1 }
 0x181   : > { %v478_v46 = vadd.f32 %v900_v36, %v477_v42 }
 0x182   : > { %v487_v47 = vmax.f32 %v483_v41, 0.0 }
 0x183   : > { %v486_v50 = vmax.f32 %v478_v46, 0.0 }
 0x184   : > { %v665_v53 = vmul.f32 %v627_v38, %v487_v47  ;;  %v667_v54 = vmul.f32 %v631_v43, %v487_v47  ;;  %v669_v55 = vmul.f32 %v635_v44, %v487_v47  ;;  %v671_v56 = vmul.f32 %v639_v45, %v487_v47 }
 0x185   : > { %v664_v57 = vmul.f32 %v627_v38, %v486_v50  ;;  %v666_v58 = vmul.f32 %v631_v43, %v486_v50  ;;  %v668_v59 = vmul.f32 %v635_v44, %v486_v50  ;;  %v670_v60 = vmul.f32 %v639_v45, %v486_v50 }
 0x186   : > { %v672_v61 = vmul.f32 %v643_v48, %v486_v50  ;;  %v673_v62 = vmul.f32 %v643_v48, %v487_v47  ;;  %v674_v63 = vmul.f32 %v647_v49, %v486_v50  ;;  %v675_v1 = vmul.f32 %v647_v49, %v487_v47 }
 0x187   : > { %v1011_v2 = vpack.c.bf16 %v665_v53, %v664_v57  ;;  %v1014_v3 = vpack.c.bf16 %v667_v54, %v666_v58  ;;  %v1017_v4 = vpack.c.bf16 %v669_v55, %v668_v59  ;;  %v1020_v5 = vpack.c.bf16 %v671_v56, %v670_v60  ;;  %v568_v6 = vpop.f32.mrb[2].mxu1 }
 0x188   : > { %v1023_v7 = vpack.c.bf16 %v673_v62, %v672_v61  ;;  %v1026_v8 = vpack.c.bf16 %v675_v1, %v674_v63  ;;  %v676_v9 = vmul.f32 %v651_v51, %v486_v50  ;;  %v677_v10 = vmul.f32 %v651_v51, %v487_v47  ;;  %v960_v11 = vpop.f32.mrb[3].mxu1 }
 0x189   : > { %1012 = vmatpush3.bf16.xpose.msra.mxu0 %v1011_v2  ;;  %v678_v12 = vmul.f32 %v655_v52, %v486_v50  ;;  %v679_v13 = vmul.f32 %v655_v52, %v487_v47  ;;  %v569_v17 = vadd.f32 %v903_v16, %v568_v6 }
 0x18a   : > { %1013 = vmatprep.subr.bf16.mxu0 %v1315_v0  ;;  %v1029_v14 = vpack.c.bf16 %v677_v10, %v676_v9 }
 0x18b   : > { %v1032_v15 = vpack.c.bf16 %v679_v13, %v678_v12  ;;  %v572_v18 = vmax.f32 %v569_v17, 0.0 }
 0x191   : > { %1015 = vmatpush3.bf16.xpose.msra.mxu0 %v1014_v3 }
 0x192   : > { %1016 = vmatprep.subr.bf16.mxu0 %v1315_v0 }
 0x199   : > { %1018 = vmatpush3.bf16.xpose.msra.mxu0 %v1017_v4 }
 0x19a   : > { %1019 = vmatprep.subr.bf16.mxu0 %v1315_v0 }
 0x1a1   : > { %1021 = vmatpush3.bf16.xpose.msra.mxu0 %v1020_v5 }
 0x1a2   : > { %1022 = vmatprep.subr.bf16.mxu0 %v1315_v0 }
 0x1a9   : > { %1024 = vmatpush3.bf16.xpose.msra.mxu0 %v1023_v7 }
 0x1aa   : > { %1025 = vmatprep.subr.bf16.mxu0 %v1315_v0 }
 0x1b1   : > { %1027 = vmatpush3.bf16.xpose.msra.mxu0 %v1026_v8 }
 0x1b2   : > { %1028 = vmatprep.subr.bf16.mxu0 %v1315_v0 }
 0x1b9   : > { %1030 = vmatpush3.bf16.xpose.msra.mxu0 %v1029_v14 }
 0x1ba   : > { %1031 = vmatprep.subr.bf16.mxu0 %v1315_v0 }
 0x1c1   : > { %1033 = vmatpush3.bf16.xpose.msra.mxu0 %v1032_v15 }
 0x1c8   : > { %994 = vmatmul.mubr.f32.vlgmr.msra.gmra.mrb[0].mxu0 %v572_v18 }
 0x29b   : > { %v753_v20 = vpop.f32.mrb[0].mxu0 }
 0x29c   : > { %v754_v0 = vadd.f32 %v905_v19, %v753_v20  ;;  %v995_v21 = vpop.f32.mrb[1].mxu0 }
 0x29e   : > { %757 = vst [vmem:[%s389_s15] sm:$0xff] %v754_v0 }
 0x29f   : > { %1242 = shalt.err (!%p1239_p7)
}
 0x2a0   : > { %s1243_s16 = scalar_lea.hbm %s1644_s4, 128  ;;  %s1247_s2 = scalar_lea.hbm %s1696_s8, 256 }
 0x2a1   : > { %p1244_p2 = scmp.ne.s32.totalorder %s1644_s4, %s1243_s16  ;;  %p1248_p0 = scmp.lt.u32.totalorder %s1644_s4, %s1696_s8 }
 0x2a2   : > { %p1249_p9 = scmp.lt.u32.totalorder %s1247_s2, %s1243_s16  ;;  %p1251_p1 = scmp.lt.u32.totalorder %s1243_s16, %s1644_s4 }
 0x2a3   : > { %p1245_p8 = pnand %p1244_p2, %p1731_p13 }
 0x2a4   : > { %p1250_p12 = por %p1249_p9, %p1248_p0 }
 0x2a5   : > { %p1246_p11 = pneg %p1245_p8 }
 0x2a6   : > { %p1252_p6 = por %p1251_p1, %p1250_p12 }
 0x2a8   : > { %p1253_p10 = pnand %p1252_p6, %p1246_p11 }
 0x2aa   : > { %1256 = shalt.err (!%p1253_p10)
}
 0x2ab   : > { %1046 = dma.vmem_to_hbm [thread:$0]  (%p1731_p13), %s1646_s19, 128, %s1644_s4, %s759_s0  }
 0x2ac PF: > { %s784_s24 = sand.u32 1, %s1295_s27   ;;  %p1732_p4 = scmp.ne.s32.totalorder %s1711_s12, 0 }
 0x2ad   : > { %p1733_p5 = scmp.ge.s32.totalorder %s1307_s30, 2  ;;  %s785_s26 = scalar_lea.sflag [#allocation4], %s784_s24 }
 0x2af   : > { %p1063_p3 = pnand %p1733_p5, %p1732_p4 }
 0x2b1   : > { %1290 = dma.done.wait (!%p1063_p3), %s785_s26, 128  }
 0x2b2   : > { %1292 = vsyncadd (!%p1063_p3), %s785_s26, 4294967168  ;;  %s1734_s30 = sld [smem:[#allocation17_spill]]  ;;  %s1735_s14 = sld [smem:[#allocation16_spill]] }
 0x2b3   : > { %s1736_s29 = sld [smem:[#allocation18_spill]]  ;;  %s1737_s27 = smov %s1299_s28 }
 0x2b8   : > { %p25_p7 = scmp.ge.s32.totalorder %s1734_s30, 4   ;;  %s1738_s28 = smov %s1735_s14 }
 0x2ba   :  { %27 = sbr.rel (!%p25_p7) target bundleno = 12 (0xc), region = 118 }
 0x2c1   :  { %790 = vsyncpa [#allocation3], 1 }
 0x2c2   :  { %792 = vsyncpa [#allocation3 + $0x1], 1 }
 0x2c3   :  { %793 = vsyncpa [#allocation6], 1 }
 0x2c4   :  { %795 = vsyncpa [#allocation6 + $0x1], 1 }
 0x2c5   :  { %796 = vsyncpa [#allocation9], 1 }
 0x2c6   :  { %797 = vsyncpa [#allocation4], 1 }
 0x2c7   :  { %799 = vsyncpa [#allocation4 + $0x1], 1 }

</bundles_post_ra>
